<compile_context>
chip_gen: v7x
topology: tpu7x:2x2x1
jax: 0.10.0
libtpu: 0.0.40
codegen_flags: <defaults>
</compile_context>

<pallas_src>
import functools

import jax
import jax.numpy as jnp
from jax.experimental import pallas as pl
from jax.experimental.pallas import tpu as pltpu

EPS = 1e-5          # nn.GroupNorm default
NEG_SLOPE = 0.01    # F.leaky_relu default


def _gn_stats_kernel(x_ref, o_ref):
    """Per-channel [sum, sumsq], accumulated over the D-tile (inner) grid axis.

    x_ref : (1, C, TD, HWp) f32   (lane-padded columns are exact zeros)
    o_ref : (1, C, 2)       f32   revisited across the D-tile axis
    """
    @pl.when(pl.program_id(1) == 0)
    def _():
        o_ref[...] = jnp.zeros_like(o_ref)

    x = x_ref[0]                                                   # (C, TD, HWp)
    s = jnp.sum(jnp.sum(x, axis=2), axis=1, keepdims=True)         # (C, 1)
    ss = jnp.sum(jnp.sum(x * x, axis=2), axis=1, keepdims=True)    # (C, 1)
    o_ref[0] += jnp.concatenate([s, ss], axis=1)                   # (C, 2)


def _residual_inner_kernel(x_ref, xany_ref, scale_ref, bias_ref, mask_ref,
                           w_ref, o_ref, r_ref, hlo_ref, hhi_ref, sem_ref,
                           *, C, D, TD, TJ, W, HWp):
    """One (batch, D-tile) step: normalize + LeakyReLU + 3x3x3 conv.

    x_ref    : (1, C, TD, HWp)  f32 main D-tile (unpadded spatial, lane-padded)
    xany_ref : (N, C, D, HWp)   f32 full input in HBM (halo-plane DMAs only)
    scale_ref, bias_ref : (1, C, 1) f32 folded GroupNorm affine for this batch
    mask_ref : (9, HWp)         bf16 per-tap H/W border validity masks
    w_ref    : (3, C, 9C)       bf16 conv taps, w[kd][co, (kh*3+kw)*C + ci]
    o_ref    : (1, C, TD*HWp)   f32 conv output (lane = d_local*HWp + p)
    r_ref    : VMEM (9C, (TD+2)*HWp) bf16 shifted/masked activation slots
    hlo_ref, hhi_ref : VMEM (1, C, 1, HWp) f32 halo planes
    sem_ref  : DMA semaphores (2,)
    """
    n = pl.program_id(0)
    dt = pl.program_id(1)
    d0 = dt * TD

    # ---- D-halo planes: clamped manual DMAs, overlapped with the main work --
    d_lo = jnp.maximum(d0 - 1, 0)
    d_hi = jnp.minimum(d0 + TD, D - 1)
    cp_lo = pltpu.make_async_copy(
        xany_ref.at[pl.ds(n, 1), :, pl.ds(d_lo, 1), :], hlo_ref, sem_ref.at[0])
    cp_hi = pltpu.make_async_copy(
        xany_ref.at[pl.ds(n, 1), :, pl.ds(d_hi, 1), :], hhi_ref, sem_ref.at[1])
    cp_lo.start()
    cp_hi.start()

    scale = scale_ref[0]                    # (C, 1)
    bias = bias_ref[0]                      # (C, 1)
    mask = mask_ref[...]                    # (9, HWp) bf16

    # lane offsets of the 9 (kh, kw) taps in the flattened (unpadded) plane.
    offs = [(kh - 1) * W + (kw - 1) for kh in range(3) for kw in range(3)]
    ztail = {a: jnp.zeros((C, a), jnp.bfloat16)
             for a in set(abs(o) for o in offs if o != 0)}          # hoisted

    def build_slot(x_plane, slot, valid):
        # GroupNorm (folded affine) + LeakyReLU; `valid` zeroes out-of-volume
        # D-halo planes AFTER normalization (conv zero-padding semantics).
        z = x_plane * scale + bias
        if valid is not None:
            z = z * valid
        y = jnp.where(z > 0.0, z, NEG_SLOPE * z).astype(jnp.bfloat16)
        pieces = []
        for t, off in enumerate(offs):
            if off == 0:
                sh = y
            elif off > 0:
                sh = jnp.concatenate([y[:, off:], ztail[off]], axis=1)
            else:
                sh = jnp.concatenate([ztail[-off], y[:, :off]], axis=1)
            # per-tap mask kills row-wrap / out-of-plane reads (H/W borders).
            pieces.append(sh * mask[t:t + 1, :])
        # one (9C, HWp) slab store per plane slot (128-aligned lane offset).
        r_ref[:, slot * HWp:(slot + 1) * HWp] = jnp.concatenate(pieces, axis=0)

    # main TD planes while the halo DMAs are in flight.
    # TODO(synk): switch to lax.fori_loop(unroll=2..4) for large TD.
    for s in range(TD):
        build_slot(x_ref[0, :, s, :], s + 1, None)

    cp_lo.wait()
    cp_hi.wait()
    lo_valid = (dt > 0).astype(jnp.float32)
    hi_valid = (dt < pl.num_programs(1) - 1).astype(jnp.float32)
    build_slot(hlo_ref[0, :, 0, :], 0, lo_valid)
    build_slot(hhi_ref[0, :, 0, :], TD + 1, hi_valid)

    # ---- conv: 3 accumulating (C, 9C) x (9C, tj*HWp) bf16 matmuls per chunk --
    w = w_ref[...]                          # (3, C, 9C) bf16, hoisted
    for j0 in range(0, TD, TJ):
        tj = min(TJ, TD - j0)
        acc = jnp.dot(w[0], r_ref[:, j0 * HWp:(j0 + tj) * HWp],
                      preferred_element_type=jnp.float32)
        for kd in (1, 2):
            acc = acc + jnp.dot(
                w[kd], r_ref[:, (j0 + kd) * HWp:(j0 + kd + tj) * HWp],
                preferred_element_type=jnp.float32)
        o_ref[0, :, j0 * HWp:(j0 + tj) * HWp] = acc.astype(o_ref.dtype)


def residual_inner(x_ncdhw, gamma, beta, weight_oidhw, groups):
    """GroupNorm -> LeakyReLU -> Conv3d(3, pad=1, no bias). NCDHW in/out."""
    N, C, D, H, W = x_ncdhw.shape
    assert C % groups == 0
    G = groups
    Cg = C // G
    HW = H * W
    HW_pad = ((HW + 127) // 128) * 128

    # D tile size: multiple of 8 (sublane rule) when possible, else whole D.
    TD = 8 if (D % 8 == 0) else D
    nDT = D // TD
    # lane-chunk width of the conv matmul / output store (keeps acc small).
    TJ = max(1, min(TD, (2 << 20) // max(C * HW_pad * 4, 1)))

    # flatten the spatial plane onto lanes; pad lanes to a multiple of 128.
    # TODO(synk): the lane pad / final lane crop only copy at toy sizes
    # (H*W not a multiple of 128); at realistic volumes they are no-ops.
    x4 = x_ncdhw.reshape(N, C, D, HW).astype(jnp.float32)
    if HW_pad != HW:
        x4 = jnp.pad(x4, ((0, 0), (0, 0), (0, 0), (0, HW_pad - HW)))

    # ------------------ pass 1: GroupNorm statistics (Pallas) ----------------
    sums = pl.pallas_call(
        _gn_stats_kernel,
        out_shape=jax.ShapeDtypeStruct((N, C, 2), jnp.float32),
        grid_spec=pltpu.PrefetchScalarGridSpec(
            num_scalar_prefetch=0,
            grid=(N, nDT),
            in_specs=[pl.BlockSpec((1, C, TD, HW_pad), lambda n, d: (n, 0, d, 0))],
            out_specs=pl.BlockSpec((1, C, 2), lambda n, d: (n, 0, 0)),
        ),
        compiler_params=pltpu.CompilerParams(
            dimension_semantics=("parallel", "arbitrary")),
    )(x4)

    # fold GroupNorm affine into one per-(n, c) scale/bias fma (tiny math).
    cnt = float(Cg * D * HW)
    s = sums[..., 0].reshape(N, G, Cg).sum(axis=2)        # (N, G)
    ss = sums[..., 1].reshape(N, G, Cg).sum(axis=2)       # (N, G)
    mean_g = s / cnt
    var_g = ss / cnt - mean_g * mean_g
    inv_g = jax.lax.rsqrt(var_g + EPS)
    mean_c = jnp.repeat(mean_g, Cg, axis=1)               # (N, C)
    inv_c = jnp.repeat(inv_g, Cg, axis=1)                 # (N, C)
    scale = (gamma[None, :] * inv_c).astype(jnp.float32)
    bias = (beta[None, :] - mean_c * scale).astype(jnp.float32)
    scale = scale[:, :, None]                             # (N, C, 1)
    bias = bias[:, :, None]

    # per-tap H/W border validity masks over the flattened unpadded plane.
    hh = jnp.arange(H)
    ww = jnp.arange(W)
    mlist = []
    for kh in range(3):
        for kw in range(3):
            mh = (hh + kh - 1 >= 0) & (hh + kh - 1 < H)
            mw = (ww + kw - 1 >= 0) & (ww + kw - 1 < W)
            mlist.append((mh[:, None] & mw[None, :]).reshape(HW))
    masks = jnp.stack(mlist, axis=0).astype(jnp.bfloat16)          # (9, HW)
    if HW_pad != HW:
        masks = jnp.pad(masks, ((0, 0), (0, HW_pad - HW)))

    # conv weight (Cout, Cin, 3,3,3) -> (3, Cout, 9*Cin), kd-major, tap-major.
    wmat = jnp.transpose(weight_oidhw, (2, 0, 3, 4, 1)).reshape(3, C, 9 * C)
    wmat = wmat.astype(jnp.bfloat16)

    kernel = functools.partial(_residual_inner_kernel,
                               C=C, D=D, TD=TD, TJ=TJ, W=W, HWp=HW_pad)

    # scoped VMEM derived from actual block / scratch sizes (not hardcoded).
    in_block = C * TD * HW_pad * 4
    out_block = C * TD * HW_pad * 4
    r_bytes = 9 * C * (TD + 2) * HW_pad * 2
    halo_bytes = 2 * C * HW_pad * 4
    small = 9 * HW_pad * 2 + 3 * C * 9 * C * 2 + 2 * C * 4
    acc_bytes = C * TJ * HW_pad * 4
    vmem_est = 2 * (in_block + out_block + small) + r_bytes + halo_bytes + 4 * acc_bytes
    vmem_limit = int(min(max(2 * vmem_est, 32 * 1024 * 1024), 96 * 1024 * 1024))
    # TODO(synk): on v7x (64 MiB VMEM) shrink TD if vmem_est approaches the cap.

    out = pl.pallas_call(
        kernel,
        out_shape=jax.ShapeDtypeStruct((N, C, D * HW_pad), jnp.float32),
        grid_spec=pltpu.PrefetchScalarGridSpec(
            num_scalar_prefetch=0,
            grid=(N, nDT),
            in_specs=[
                pl.BlockSpec((1, C, TD, HW_pad), lambda n, d: (n, 0, d, 0)),
                pl.BlockSpec(memory_space=pl.ANY),          # halo-plane DMAs
                pl.BlockSpec((1, C, 1), lambda n, d: (n, 0, 0)),
                pl.BlockSpec((1, C, 1), lambda n, d: (n, 0, 0)),
                pl.BlockSpec((9, HW_pad), lambda n, d: (0, 0)),
                pl.BlockSpec((3, C, 9 * C), lambda n, d: (0, 0, 0)),
            ],
            out_specs=pl.BlockSpec((1, C, TD * HW_pad), lambda n, d: (n, 0, d)),
            scratch_shapes=[
                pltpu.VMEM((9 * C, (TD + 2) * HW_pad), jnp.bfloat16),
                pltpu.VMEM((1, C, 1, HW_pad), jnp.float32),
                pltpu.VMEM((1, C, 1, HW_pad), jnp.float32),
                pltpu.SemaphoreType.DMA((2,)),
            ]),
        compiler_params=pltpu.CompilerParams(
            dimension_semantics=("parallel", "parallel"),
            vmem_limit_bytes=vmem_limit),
    )(x4, x4, scale, bias, masks, wmat)

    out = out.reshape(N, C, D, HW_pad)
    if HW_pad != HW:
        out = out[..., :HW]
    return out.reshape(N, C, D, H, W)


def reference(x_ncdhw, gamma, beta, weight_oidhw, groups):
    """Pure-JAX reference matching the PyTorch module semantics."""
    N, C, D, H, W = x_ncdhw.shape
    Cg = C // groups
    xg = x_ncdhw.reshape(N, groups, Cg, D, H, W)
    mean = xg.mean(axis=(2, 3, 4, 5), keepdims=True)
    var = xg.var(axis=(2, 3, 4, 5), keepdims=True)
    xn = (xg - mean) / jnp.sqrt(var + EPS)
    xn = xn.reshape(N, C, D, H, W)
    xn = xn * gamma[None, :, None, None, None] + beta[None, :, None, None, None]
    y = jnp.where(xn > 0, xn, NEG_SLOPE * xn)
    return jax.lax.conv_general_dilated(
        y, weight_oidhw, window_strides=(1, 1, 1),
        padding=((1, 1), (1, 1), (1, 1)),
        dimension_numbers=("NCDHW", "OIDHW", "NCDHW"),
        precision=jax.lax.Precision.HIGHEST)


if __name__ == "__main__":
    key = jax.random.PRNGKey(0)
    # D=16 with TD=8 exercises both interior halos and the zeroed boundary halos.
    N, C, D, H, W = 2, 8, 16, 8, 8
    groups = 4

    k1, k2, k3, k4 = jax.random.split(key, 4)
    x = jax.random.normal(k1, (N, C, D, H, W), jnp.float32)
    gamma = 1.0 + 0.1 * jax.random.normal(k2, (C,), jnp.float32)
    beta = 0.1 * jax.random.normal(k3, (C,), jnp.float32)
    weight = 0.1 * jax.random.normal(k4, (C, C, 3, 3, 3), jnp.float32)

    out = jax.block_until_ready(residual_inner(x, gamma, beta, weight, groups))
    ref = jax.block_until_ready(reference(x, gamma, beta, weight, groups))

    assert out.shape == ref.shape, (out.shape, ref.shape)
    max_err = float(jnp.max(jnp.abs(out - ref)))
    if not bool(jnp.allclose(out, ref, atol=3e-2, rtol=3e-2)):
        raise AssertionError(f"kernel/reference mismatch, max abs err = {max_err}")
    print("KERNEL_OK")
</pallas_src>

<mosaic_0001>
module attributes {stable_mosaic.version = 11 : i64} {
  func.func @_gn_stats_kernel(%arg0: i32, %arg1: i32, %arg2: memref<1x8x8x128xf32, #tpu.memory_space<vmem>>, %arg3: memref<1x8x2xf32, #tpu.memory_space<vmem>>) attributes {dimension_semantics = [#tpu.dimension_semantics<parallel>, #tpu.dimension_semantics<arbitrary>], iteration_bounds = array<i64: 2, 2>, scalar_prefetch = 0 : i64, scratch_operands = 0 : i64, tpu.core_type = #tpu.core_type<tc>, window_params = [{transform_indices = @transform_0, window_bounds = array<i64: 1, 8, 8, 128>}, {transform_indices = @transform_1, window_bounds = array<i64: 1, 8, 2>}]} {
    %c0_i32 = arith.constant 0 : i32
    %0 = arith.cmpi eq, %arg1, %c0_i32 : i32
    %1 = arith.extui %0 : i1 to i32
    %c0_i32_0 = arith.constant 0 : i32
    %2 = arith.cmpi ne, %1, %c0_i32_0 : i32
    scf.if %2 {
      %cst_13 = arith.constant 0.000000e+00 : f32
      %19 = vector.broadcast %cst_13 : f32 to vector<1x8x2xf32>
      %c0_14 = arith.constant 0 : index
      %c0_15 = arith.constant 0 : index
      %c0_16 = arith.constant 0 : index
      %20 = vector.load %arg3[%c0_14, %c0_15, %c0_16] : memref<1x8x2xf32, #tpu.memory_space<vmem>>, vector<1x8x2xf32>
      tpu.vector_store %arg3[%c0_14, %c0_15, %c0_16], %19 {strides = array<i32>} : memref<1x8x2xf32, #tpu.memory_space<vmem>>, vector<1x8x2xf32>,
    } else {
    }
    %c0 = arith.constant 0 : index
    %c0_1 = arith.constant 0 : index
    %c0_2 = arith.constant 0 : index
    %c0_3 = arith.constant 0 : index
    %3 = vector.load %arg2[%c0, %c0_1, %c0_2, %c0_3] : memref<1x8x8x128xf32, #tpu.memory_space<vmem>>, vector<1x8x8x128xf32>
    %4 = vector.shape_cast %3 : vector<1x8x8x128xf32> to vector<8x8x128xf32>
    %cst = arith.constant dense<0.000000e+00> : vector<8x8xf32>
    %5 = vector.multi_reduction <add>, %4, %cst [2] : vector<8x8x128xf32> to vector<8x8xf32>
    %cst_4 = arith.constant dense<0.000000e+00> : vector<8xf32>
    %6 = vector.multi_reduction <add>, %5, %cst_4 [1] : vector<8x8xf32> to vector<8xf32>
    %7 = vector.shape_cast %6 : vector<8xf32> to vector<8x1xf32>
    %8 = arith.mulf %4, %4 : vector<8x8x128xf32>
    %cst_5 = arith.constant dense<0.000000e+00> : vector<8x8xf32>
    %9 = vector.multi_reduction <add>, %8, %cst_5 [2] : vector<8x8x128xf32> to vector<8x8xf32>
    %cst_6 = arith.constant dense<0.000000e+00> : vector<8xf32>
    %10 = vector.multi_reduction <add>, %9, %cst_6 [1] : vector<8x8xf32> to vector<8xf32>
    %11 = vector.shape_cast %10 : vector<8xf32> to vector<8x1xf32>
    %c0_7 = arith.constant 0 : index
    %c0_8 = arith.constant 0 : index
    %c0_9 = arith.constant 0 : index
    %12 = vector.load %arg3[%c0_7, %c0_8, %c0_9] : memref<1x8x2xf32, #tpu.memory_space<vmem>>, vector<1x8x2xf32>
    %13 = vector.shape_cast %12 : vector<1x8x2xf32> to vector<8x2xf32>
    %14 = tpu.concatenate %7, %11 in 1 : vector<8x1xf32>, vector<8x1xf32> -> vector<8x2xf32>
    %15 = arith.addf %13, %14 : vector<8x2xf32>
    %c0_10 = arith.constant 0 : index
    %c0_11 = arith.constant 0 : index
    %c0_12 = arith.constant 0 : index
    %16 = vector.load %arg3[%c0_10, %c0_11, %c0_12] : memref<1x8x2xf32, #tpu.memory_space<vmem>>, vector<1x8x2xf32>
    %17 = vector.shape_cast %16 : vector<1x8x2xf32> to vector<8x2xf32>
    %18 = vector.shape_cast %15 : vector<8x2xf32> to vector<1x8x2xf32>
    tpu.vector_store %arg3[%c0_10, %c0_11, %c0_12], %18 {strides = array<i32>} : memref<1x8x2xf32, #tpu.memory_space<vmem>>, vector<1x8x2xf32>,
    return
  }
  func.func @transform_0(%arg0: i32, %arg1: i32) -> (i32, i32, i32, i32) {
    %c0_i32 = arith.constant 0 : i32
    %c0_i32_0 = arith.constant 0 : i32
    %c0_i32_1 = arith.constant 0 : i32
    return %arg0, %c0_i32, %arg1, %c0_i32_0 : i32, i32, i32, i32
  }
  func.func @transform_1(%arg0: i32, %arg1: i32) -> (i32, i32, i32) {
    %c0_i32 = arith.constant 0 : i32
    %c0_i32_0 = arith.constant 0 : i32
    %c0_i32_1 = arith.constant 0 : i32
    return %arg0, %c0_i32, %c0_i32_0 : i32, i32, i32
  }
}

</mosaic_0001>

<bundles_post_ra>
// kernel: tpu_custom_call.1
= control target key start
LH: loop header
LB: loop body
LE: loop exit
PB: predicated region body
PF: predicated region fallthrough
CT: control target
= control target key end

     0   :  { %6 = vsyncpa [#allocation3], 0  ;;  %s780_s0 = inlined_call_operand.hbm [shape: f32[2,8,16,128], index: 0, kind: input, shape index: {}]   ;;  %s781_s1 = inlined_call_operand.vmem [shape: f32[2,8,2], index: 1, kind: output, shape index: {}]  }
   0x1   :  { %8 = vsyncpa [#allocation3 + $0x1], 0  ;;  %s601_s6 = smov 0   ;;  %s603_s7 = smov 0  }
   0x2   :  { %s605_s8 = smov 0   ;;  %s607_s9 = smov 0  }
   0x3   :  { %s609_s10 = smov 0   ;;  %s611_s11 = smov 0  }
   0x4   :  { %s613_s12 = smov 0   ;;  %s615_s13 = smov 0  }
   0x5 LB: > { %s400_s14 = sadd.s32 4294967295, %s584_s13   ;;  %s23_s15 = sadd.s32 1, %s576_s11  ;;  %s584_s13 = sphi %s615_s13, %s14_s13   ;;  %s580_s12 = sphi %s613_s12, %s792_s12   ;;  %s576_s11 = sphi %s611_s11, %s791_s11   ;;  %s572_s10 = sphi %s609_s10, %s790_s10   ;;  %s568_s9 = sphi %s607_s9, %s789_s9   ;;  %s564_s8 = sphi %s605_s8, %s788_s8   ;;  %s560_s7 = sphi %s603_s7, %s787_s7   ;;  %s556_s6 = sphi %s601_s6, %s786_s6  }
   0x6   : > { %p24_p0 = scmp.ge.s32.totalorder %s23_s15, 2  ;;  %s26_s16 = sadd.s32 1, %s580_s12 }
   0x7   : > { %s35_s17 = sadd.s32 1, %s564_s8  ;;  %p42_p1 = scmp.ne.s32.totalorder %s564_s8, %s560_s7 }
   0x8   : > { %s794_s15 = smov (%p24_p0, %s23_s15), 0  ;;  %s796_s16 = smov (!%p24_p0, %s26_s16), %s580_s12 }
   0x9   : > { %s31_s18 = ssub.s32 %s576_s11, %s794_s15  ;;  %p43_p2 = scmp.eq.s32.totalorder %s584_s13, 0 }
   0xa   : > { %p28_p3 = scmp.ge.s32.totalorder %s796_s16, 2  ;;  %p48_p4 = scmp.ne.s32.totalorder %s560_s7, %s556_s6 }
   0xb   : > { %p652_p5 = por %p43_p2, %p42_p1  ;;  %p49_p6 = scmp.eq.s32.totalorder %s400_s14, 0 }
   0xc   : > { %s798_s16 = smov (%p28_p3, %s796_s16), 0  ;;  %p419_p8 = scmp.lt.s32.totalorder %s584_s13, 4 }
   0xd   : > { %p658_p7 = por %p49_p6, %p48_p4  ;;  %s30_s21 = ssub.s32 %s580_s12, %s798_s16 }
   0xe   : > { %s32_s22 = sor.u32 %s31_s18, %s30_s21  ;;  %s98_s23 = sand.u32 1, %s564_s8  }
   0xf   : > { %p33_p9 = scmp.eq.s32.totalorder %s32_s22, 0  ;;  %s404_s24 = sshll.u32 %s98_s23, 6 }
  0x10   : > { %s405_s25 = sshll.u32 %s580_s12, 4  ;;  %s102_s29 = scalar_lea.vmem [#allocation2], %s404_s24 }
  0x11   : > { %s668_s26 = scalar_select %p33_p9, %s564_s8, %s35_s17  }
  0x12   : > { %s107_s27 = sadd.s32 %s576_s11, %s405_s25  ;;  %s110_s30 = sshll.u32 %s102_s29, 4  ;;  %s676_s30 = int_to_ptr.vmem [resolvable:$true] %s110_s30 }
  0x13   : > { %s406_s28 = sshll.u32 %s107_s27, 7  ;;  %p682_p10 = pnand %p419_p8, %p652_p5 }
  0x14   : > { %s674_s4 = scalar_lea.hbm %s780_s0, %s406_s28  ;;  %s687_s6 = scalar_lea.sflag [#allocation3], %s98_s23 }
  0x15   : > { %s488_s14 = scalar_lea.hbm %s674_s4, 1024  ;;  %p490_p13 = pneg %p682_p10 }
  0x16   : > { %p489_p12 = scmp.ne.s32.totalorder %s674_s4, %s488_s14  ;;  %s493_s19 = scalar_lea.hbm %s780_s0, 4096 }
  0x17   : > { %p494_p2 = scmp.lt.u32.totalorder %s674_s4, %s780_s0  ;;  %p495_p3 = scmp.lt.u32.totalorder %s493_s19, %s488_s14 }
  0x18   : > { %p491_p0 = pnand %p490_p13, %p489_p12  ;;  %p497_p5 = scmp.lt.u32.totalorder %s488_s14, %s674_s4 }
  0x19   : > { %p496_p4 = por %p495_p3, %p494_p2 }
  0x1a   : > { %p492_p1 = pneg %p491_p0 }
  0x1b   : > { %p498_p6 = por %p497_p5, %p496_p4 }
  0x1d   : > { %p499_p8 = pnand %p498_p6, %p492_p1 }
  0x1f   : > { %502 = shalt.err (!%p499_p8)
}
  0x20   : > { %s503_s23 = scalar_lea.vmem %s676_s30, 1024  ;;  %s586_s24 = smov [#allocation2]  }
  0x21   : > { %p504_p9 = scmp.ne.s32.totalorder %s676_s30, %s503_s23  ;;  %s508_s25 = sshll.u32 %s586_s24, 4  ;;  %s509_s25 = int_to_ptr.vmem [resolvable:$false] %s508_s25 }
  0x22   : > { %s510_s27 = scalar_lea.vmem %s509_s25, 2048  ;;  %p511_p11 = scmp.lt.s32.totalorder %s676_s30, %s509_s25 }
  0x23   : > { %p506_p12 = pnand %p504_p9, %p490_p13  ;;  %p512_p2 = scmp.lt.s32.totalorder %s510_s27, %s503_s23 }
  0x25   : > { %p507_p0 = pneg %p506_p12  ;;  %p513_p3 = por %p512_p2, %p511_p11 }
  0x27   : > { %p514_p4 = pnand %p513_p3, %p507_p0 }
  0x29   : > { %517 = shalt.err (!%p514_p4)
}
  0x2a   : > { %s587_s28 = smov 256   ;;  %s588_s29 = smov 128  }
  0x2b   : > { %s589_s2 = smov 8   ;;  %p118_p13 = scmp.lt.s32.totalorder %s584_s13, 5 }
  0x2c   : > { %418 = dma.hbm_to_vmem [thread:$0]  (!%p682_p10), %s674_s4, 1024, %s676_s30, %s687_s6, %s587_s28, %s588_s29, %s589_s2  }
  0x2d   : > { %p785_p1 = scmp.ge.s32.totalorder %s584_s13, 1 }
  0x2f   : > { %p119_p5 = pnand %p785_p1, %p118_p13 }
  0x30   : > { %s124_s3 = sand.u32 (!%p119_p5), 1, %s560_s7  }
  0x31   : > { %122 = sbr.rel (%p119_p5) target bundleno = 389 (0x185), region = 24  ;;  %s408_s14 = sshll.u32 (!%p119_p5), %s124_s3, 6 }
  0x32   : > { %s125_s17 = scalar_lea.sflag (!%p119_p5), [#allocation3], %s124_s3  ;;  %s719_s18 = scalar_lea.vmem (!%p119_p5), [#allocation2], %s408_s14 }
  0x38   : > { %551 = dma.done.wait (%p658_p7), %s125_s17, 1024  }
  0x39   : > { %553 = vsyncadd (%p658_p7), %s125_s17, 4294966272  ;;  %p146_p11 = scmp.lt.s32.totalorder %s572_s10, 1  ;;  %p410_p10 = scmp.ne.s32.totalorder %s568_s9, 0 }
  0x3a   : > { %vm154_vm0 = vcmask (!%p410_p10), 15360   ;;  %v590_v0 = vmov (!%p410_p10), 0.0  }
  0x3b   : > { %s800_s10 = smov (!%p146_p11, %s572_s10), 1  ;;  %153 = sbr.rel (%p410_p10) target bundleno = 66 (0x42), region = 32 }
  0x3c   : > { %s409_s30 = sshll.u32 %s800_s10, 3 }
  0x3d   : > { %s730_s6 = scalar_lea.vmem %s781_s1, %s409_s30 }
  0x3e   : > { %155 = vst.msk [vmem:[%s730_s6] sm:$0xff] (!%p410_p10), %vm154_vm0, %v590_v0 }
  0x42 PF: > { %v156_v1 = vld [vmem:[%s719_s18] sm:$0xff]  ;;  %v157_v2 = vld [vmem:[%s719_s18 + $0x8] sm:$0xff]  ;;  %v158_v5 = vld [vmem:[%s719_s18 + $0x10] sm:$0xff]  ;;  %v188_v23 = vlaneseq  ;;  %vm222_vm1 = vcmask 1041409   ;;  %vm224_vm2 = vcmask 1042434   ;;  %vm226_vm3 = vcmask 1043459  }
  0x43   : > { %164 = vadd.xlane.f32.xlu0 %v156_v1  ;;  %v241_v3 = vmul.f32 %v156_v1, %v156_v1  ;;  %v242_v4 = vmul.f32 %v157_v2, %v157_v2  ;;  %v243_v6 = vmul.f32 %v158_v5, %v158_v5  ;;  %v159_v7 = vld [vmem:[%s719_s18 + $0x18] sm:$0xff]  ;;  %v160_v9 = vld [vmem:[%s719_s18 + $0x20] sm:$0xff]  ;;  %v161_v11 = vld [vmem:[%s719_s18 + $0x28] sm:$0xff]  ;;  %vm228_vm4 = vcmask 1044484  }
  0x44   : > { %v244_v8 = vmul.f32 %v159_v7, %v159_v7  ;;  %v245_v10 = vmul.f32 %v160_v9, %v160_v9  ;;  %v246_v12 = vmul.f32 %v161_v11, %v161_v11  ;;  %v162_v13 = vld [vmem:[%s719_s18 + $0x30] sm:$0xff]  ;;  %v163_v15 = vld [vmem:[%s719_s18 + $0x38] sm:$0xff]  ;;  %v189_v26 = vand.u32 127, %v188_v23 }
  0x45   : > { %249 = vadd.xlane.f32.xlu1 %v241_v3  ;;  %v247_v14 = vmul.f32 %v162_v13, %v162_v13  ;;  %v248_v16 = vmul.f32 %v163_v15, %v163_v15  ;;  %v191_v27 = vshrl.u32 %v188_v23, 7  ;;  %vm230_vm5 = vcmask 1045509  }
  0x46   : > { %vm232_vm6 = vcmask 1046534   ;;  %vm234_vm7 = vcmask 1047559   ;;  %vm237_vm8 = vcmask 64512   ;;  %vm317_vm9 = vcmask 7168  }
  0x47   : > { %166 = vadd.xlane.f32.xlu0 %v157_v2  ;;  %v192_v30 = vsub.s32 %v189_v26, %v191_v27  ;;  %vm320_vm10 = vcmask 15360  }
  0x49   : > { %251 = vadd.xlane.f32.xlu1 %v242_v4 }
  0x4b   : > { %168 = vadd.xlane.f32.xlu0 %v158_v5  ;;  %v316_v5 = vld [vmem:[%s730_s6] sm:$0xff] }
  0x4d   : > { %253 = vadd.xlane.f32.xlu1 %v243_v6 }
  0x4f   : > { %170 = vadd.xlane.f32.xlu0 %v159_v7 }
  0x51   : > { %255 = vadd.xlane.f32.xlu1 %v244_v8 }
  0x53   : > { %172 = vadd.xlane.f32.xlu0 %v160_v9 }
  0x55   : > { %257 = vadd.xlane.f32.xlu1 %v245_v10 }
  0x57   : > { %174 = vadd.xlane.f32.xlu0 %v161_v11 }
  0x59   : > { %259 = vadd.xlane.f32.xlu1 %v246_v12 }
  0x5b   : > { %176 = vadd.xlane.f32.xlu0 %v162_v13 }
  0x5d   : > { %261 = vadd.xlane.f32.xlu1 %v247_v14 }
  0x5f   : > { %178 = vadd.xlane.f32.xlu0 %v163_v15 }
  0x61   : > { %263 = vadd.xlane.f32.xlu1 %v248_v16 }
  0xd0   : > { %v165_v17 = vpop.xlane.xlu0 %164 }
  0xd1   : > { %v193_v35 = vrot.slane %v165_v17, %v192_v30 }
  0xd2   : > { %v250_v18 = vpop.xlane.xlu1 %249 }
  0xd3   : > { %v276_v41 = vrot.slane %v250_v18, %v192_v30 }
  0xd4   : > { %v167_v19 = vpop.xlane.xlu0 %166 }
  0xd5   : > { %v197_v32 = vrot.slane %v167_v19, %v192_v30 }
  0xd6   : > { %v252_v20 = vpop.xlane.xlu1 %251 }
  0xd7   : > { %v280_v36 = vrot.slane %v252_v20, %v192_v30  ;;  %v223_v42 = vsel %vm222_vm1, %v197_v32, %v193_v35 }
  0xd8   : > { %v169_v21 = vpop.xlane.xlu0 %168 }
  0xd9   : > { %v201_v33 = vrot.slane %v169_v21, %v192_v30  ;;  %v305_v49 = vsel %vm222_vm1, %v280_v36, %v276_v41 }
  0xda   : > { %v254_v22 = vpop.xlane.xlu1 %253 }
  0xdb   : > { %v284_v38 = vrot.slane %v254_v22, %v192_v30  ;;  %v225_v45 = vsel %vm224_vm2, %v201_v33, %v223_v42 }
  0xdc   : > { %v171_v24 = vpop.xlane.xlu0 %170 }
  0xdd   : > { %v205_v37 = vrot.slane %v171_v24, %v192_v30  ;;  %v306_v52 = vsel %vm224_vm2, %v284_v38, %v305_v49 }
  0xde   : > { %v256_v25 = vpop.xlane.xlu1 %255 }
  0xdf   : > { %v288_v43 = vrot.slane %v256_v25, %v192_v30  ;;  %v227_v50 = vsel %vm226_vm3, %v205_v37, %v225_v45 }
  0xe0   : > { %v173_v28 = vpop.xlane.xlu0 %172 }
  0xe1   : > { %v209_v39 = vrot.slane %v173_v28, %v192_v30  ;;  %v307_v56 = vsel %vm226_vm3, %v288_v43, %v306_v52 }
  0xe2   : > { %v258_v29 = vpop.xlane.xlu1 %257 }
  0xe3   : > { %v292_v46 = vrot.slane %v258_v29, %v192_v30  ;;  %v229_v53 = vsel %vm228_vm4, %v209_v39, %v227_v50 }
  0xe4   : > { %v175_v31 = vpop.xlane.xlu0 %174 }
  0xe5   : > { %v213_v44 = vrot.slane %v175_v31, %v192_v30  ;;  %v308_v59 = vsel %vm228_vm4, %v292_v46, %v307_v56 }
  0xe6   : > { %v260_v34 = vpop.xlane.xlu1 %259 }
  0xe7   : > { %v296_v51 = vrot.slane %v260_v34, %v192_v30  ;;  %v231_v57 = vsel %vm230_vm5, %v213_v44, %v229_v53 }
  0xe8   : > { %v177_v40 = vpop.xlane.xlu0 %176 }
  0xe9   : > { %v217_v47 = vrot.slane %v177_v40, %v192_v30  ;;  %v309_v62 = vsel %vm230_vm5, %v296_v51, %v308_v59 }
  0xea   : > { %v262_v48 = vpop.xlane.xlu1 %261 }
  0xeb   : > { %v300_v54 = vrot.slane %v262_v48, %v192_v30  ;;  %v233_v61 = vsel %vm232_vm6, %v217_v47, %v231_v57 }
  0xec   : > { %v179_v55 = vpop.xlane.xlu0 %178 }
  0xed   : > { %v221_v58 = vrot.slane %v179_v55, %v192_v30  ;;  %v310_v2 = vsel %vm232_vm6, %v300_v54, %v309_v62 }
  0xee   : > { %v264_v60 = vpop.xlane.xlu1 %263 }
  0xef   : > { %v304_v63 = vrot.slane %v264_v60, %v192_v30  ;;  %v235_v0 = vsel %vm234_vm7, %v221_v58, %v233_v61 }
  0xf0   : > { %v238_v1 = vsel %vm237_vm8, %v235_v0, 0.0 }
  0xf1   : > { %239 = vadd.xlane.f32.xlu0 %v238_v1  ;;  %v311_v3 = vsel %vm234_vm7, %v304_v63, %v310_v2 }
  0xf2   : > { %v313_v4 = vsel %vm237_vm8, %v311_v3, 0.0 }
  0xf3   : > { %314 = vadd.xlane.f32.xlu1 %v313_v4 }
 0x17e   : > { %v240_v6 = vpop.xlane.xlu0 %239 }
 0x180   : > { %v315_v7 = vpop.xlane.xlu1 %314 }
 0x181   : > { %v318_v8 = vsel %vm317_vm9, %v240_v6, %v315_v7 }
 0x182   : > { %v319_v9 = vadd.f32 %v318_v8, %v316_v5 }
 0x184   : > { %321 = vst.msk [vmem:[%s730_s6] sm:$0xff] %vm320_vm10, %v319_v9 }
 0x185 PF: > { %s14_s13 = sadd.s32 1, %s584_s13   ;;  %s786_s6 = smov %s560_s7 }
 0x186   : > { %p11_p7 = scmp.ge.s32.totalorder %s14_s13, 6   ;;  %s787_s7 = smov %s564_s8 }
 0x187   : > { %s788_s8 = smov %s668_s26  ;;  %s789_s9 = smov %s576_s11 }
 0x188   : > { %s790_s10 = smov %s580_s12  ;;  %s791_s11 = smov %s794_s15 }
 0x189   : > { %s792_s12 = smov %s798_s16  ;;  %13 = sbr.rel (!%p11_p7) target bundleno = 5 (0x5), region = 68 }
 0x190   :  { %341 = vsyncpa [#allocation3], 1 }
 0x191   :  { %343 = vsyncpa [#allocation3 + $0x1], 1 }

</bundles_post_ra>
